<compile_context>
chip_gen: v6e
topology: v6e:2x2x1
jax: 0.10.0
libtpu: 0.0.40
codegen_flags: <defaults>
</compile_context>

<pallas_src>
import functools

import jax
import jax.numpy as jnp
from jax.experimental import pallas as pl
from jax.experimental.pallas import tpu as pltpu

_LANE = 128


def _round_up(v: int, m: int) -> int:
    return -(-v // m) * m


def _vae_fwd_kernel(
    x_ref, eps_ref,
    w_ih_ref, b_ih_ref,      # input_to_hidden           (input_dim, hidden) bf16, (1, hidden) f32
    w_enc_ref, b_enc_ref,    # fused mu|logvar head      (hidden, 2*P_LAT)  bf16, (1, 2*P_LAT) f32
    w_lh_ref, b_lh_ref,      # latent_to_hidden          (P_LAT, hidden)    bf16, (1, hidden) f32
    w_ho_ref, b_ho_ref,      # hidden_to_output          (hidden, P_IN)     bf16, (1, P_IN) f32
    xr_ref, z_ref, mu_ref, lv_ref,   # outputs (tb, P_IN) / (tb, P_LAT) x3, all lane-dense
    *, p_lat: int,
):
    bf16 = jnp.bfloat16

    # ----- encode -----
    xb = x_ref[...].astype(bf16)
    h = jnp.dot(xb, w_ih_ref[...], preferred_element_type=jnp.float32) + b_ih_ref[...]
    h = jnp.maximum(h, 0.0)                                  # ReLU (f32, VPU)

    enc = jnp.dot(h.astype(bf16), w_enc_ref[...],
                  preferred_element_type=jnp.float32) + b_enc_ref[...]
    mu = enc[:, :p_lat]          # 128-aligned slice: free (vreg boundary)
    logvar = enc[:, p_lat:]      # padded columns are exactly 0

    # ----- reparameterize: z = mu + exp(0.5*logvar) * eps  (== sqrt(exp(logvar))*eps)
    z = mu + jnp.exp(0.5 * logvar) * eps_ref[...]            # f32 EUP/VPU

    # ----- decode (apply_sigmoid=False in forward) -----
    h2 = jnp.dot(z.astype(bf16), w_lh_ref[...],
                 preferred_element_type=jnp.float32) + b_lh_ref[...]
    h2 = jnp.maximum(h2, 0.0)                                # ReLU
    xr = jnp.dot(h2.astype(bf16), w_ho_ref[...],
                 preferred_element_type=jnp.float32) + b_ho_ref[...]

    # Four lane-dense, unmasked full-tile stores (no concat, no masked vst).
    xr_ref[...] = xr.astype(xr_ref.dtype)
    z_ref[...] = z.astype(z_ref.dtype)
    mu_ref[...] = mu.astype(mu_ref.dtype)
    lv_ref[...] = logvar.astype(lv_ref.dtype)


def prepare_params(p):
    """One-time kernel-side parameter prep (hoisted out of the forward path).

    * fuses hidden_to_mu / hidden_to_logvar into a single head whose two halves
      each occupy a 128-aligned lane segment (zero-padded),
    * zero-pads latent_to_hidden rows and hidden_to_output columns to 128
      multiples so the decode inputs/outputs are lane-dense,
    * casts all weights to bf16 (native MXU path); biases stay f32.
    """
    input_dim, hidden = p["w_ih"].shape
    latent = p["w_mu"].shape[1]
    p_lat = _round_up(latent, _LANE)
    p_in = _round_up(input_dim, _LANE)

    def pad(a, rows=None, cols=None):
        r = (rows if rows is not None else a.shape[0]) - a.shape[0]
        c = (cols if cols is not None else a.shape[1]) - a.shape[1]
        return jnp.pad(a, ((0, r), (0, c)))

    w_enc = jnp.concatenate([pad(p["w_mu"], cols=p_lat),
                             pad(p["w_lv"], cols=p_lat)], axis=1)   # (hidden, 2*p_lat)
    b_enc = jnp.concatenate([pad(p["b_mu"], cols=p_lat),
                             pad(p["b_lv"], cols=p_lat)], axis=1)   # (1, 2*p_lat)

    bf16 = jnp.bfloat16
    return dict(
        w_ih=p["w_ih"].astype(bf16), b_ih=p["b_ih"],
        w_enc=w_enc.astype(bf16), b_enc=b_enc,
        w_lh=pad(p["w_lh"], rows=p_lat).astype(bf16), b_lh=p["b_lh"],
        w_ho=pad(p["w_ho"], cols=p_in).astype(bf16), b_ho=pad(p["b_ho"], cols=p_in),
    )


def vae_forward(x, eps, kp, *, tb=None, single_buffer_weights=False):
    """Full VAE forward pass in one batch-tiled Pallas kernel.

    Args:
      x:   (B, input_dim) float32
      eps: (B, latent_dim) float32 standard-normal noise
      kp:  dict from prepare_params()
      tb:  batch tile (multiple of 8). Default: ~B/2 capped at 512 so the grid
           has >=2 steps (v7x megacore) while staying large (v5e/v6e).
      single_buffer_weights: v7x knob — single-buffer the constant-index weight
           BlockSpecs (pipeline_mode=pl.Buffered(1)) to halve their VMEM use.
    Returns:
      (x_reconstr, latent_sampled, mu, logvar)
    """
    B, input_dim = x.shape
    latent_dim = eps.shape[1]
    hidden_dim = kp["w_ih"].shape[1]
    p_lat = kp["w_enc"].shape[1] // 2
    p_in = kp["w_ho"].shape[1]

    # Batch tile: large, sublane-aligned, and (when B allows) >= 2 grid steps.
    if tb is None:
        tb = min(512, max(8, _round_up(-(-B // 2), 8)))
    tb = max(8, _round_up(tb, 8))
    grid_b = pl.cdiv(B, tb)

    # Lane-pad eps with zeros so padded z/mu/logvar columns come out exactly 0.
    # (x is NOT padded: the ragged final batch block, if any, is handled by
    #  Pallas — garbage tail rows never reach valid output rows.)
    if p_lat != latent_dim:
        eps = jnp.pad(eps, ((0, 0), (0, p_lat - latent_dim)))

    def const_spec(shape):
        if single_buffer_weights:
            return pl.BlockSpec(shape, lambda i: (0, 0), pipeline_mode=pl.Buffered(1))
        return pl.BlockSpec(shape, lambda i: (0, 0))

    in_specs = [
        pl.BlockSpec((tb, input_dim), lambda i: (i, 0)),       # x   (batch-tiled)
        pl.BlockSpec((tb, p_lat), lambda i: (i, 0)),           # eps (batch-tiled)
        const_spec((input_dim, hidden_dim)),                   # VMEM-resident weights
        const_spec((1, hidden_dim)),
        const_spec((hidden_dim, 2 * p_lat)),
        const_spec((1, 2 * p_lat)),
        const_spec((p_lat, hidden_dim)),
        const_spec((1, hidden_dim)),
        const_spec((hidden_dim, p_in)),
        const_spec((1, p_in)),
    ]
    out_specs = [
        pl.BlockSpec((tb, p_in), lambda i: (i, 0)),            # xr
        pl.BlockSpec((tb, p_lat), lambda i: (i, 0)),           # z
        pl.BlockSpec((tb, p_lat), lambda i: (i, 0)),           # mu
        pl.BlockSpec((tb, p_lat), lambda i: (i, 0)),           # logvar
    ]
    out_shape = (
        jax.ShapeDtypeStruct((B, p_in), jnp.float32),
        jax.ShapeDtypeStruct((B, p_lat), jnp.float32),
        jax.ShapeDtypeStruct((B, p_lat), jnp.float32),
        jax.ShapeDtypeStruct((B, p_lat), jnp.float32),
    )

    # Explicit VMEM budget with headroom (double-buffered I/O tiles + bf16 weights).
    weight_bytes = 2 * (input_dim * hidden_dim + hidden_dim * 2 * p_lat
                        + p_lat * hidden_dim + hidden_dim * p_in)
    bias_bytes = 4 * (2 * hidden_dim + 2 * p_lat + p_in)
    io_bytes = 4 * tb * (input_dim + p_lat + p_in + 3 * p_lat)
    est = 2 * (weight_bytes + bias_bytes + io_bytes)
    vmem_limit = min(128 * 1024 * 1024,
                     max(32 * 1024 * 1024, int(est * 1.5) + (4 << 20)))

    xr_p, z_p, mu_p, lv_p = pl.pallas_call(
        functools.partial(_vae_fwd_kernel, p_lat=p_lat),
        out_shape=out_shape,
        grid_spec=pltpu.PrefetchScalarGridSpec(
            num_scalar_prefetch=0,
            grid=(grid_b,),
            in_specs=in_specs,
            out_specs=out_specs,
        ),
        compiler_params=pltpu.CompilerParams(
            dimension_semantics=("parallel",),
            vmem_limit_bytes=vmem_limit,
        ),
    )(
        x, eps,
        kp["w_ih"], kp["b_ih"],
        kp["w_enc"], kp["b_enc"],
        kp["w_lh"], kp["b_lh"],
        kp["w_ho"], kp["b_ho"],
    )

    # Strip lane padding only when present (zero extra passes when dims align).
    xr = xr_p if p_in == input_dim else xr_p[:, :input_dim]
    z = z_p if p_lat == latent_dim else z_p[:, :latent_dim]
    mu = mu_p if p_lat == latent_dim else mu_p[:, :latent_dim]
    logvar = lv_p if p_lat == latent_dim else lv_p[:, :latent_dim]
    return xr, z, mu, logvar


def init_params(key, input_dim, hidden_dim, latent_dim):
    """Deterministic parameter init. Weights stored as (in, out); biases as (1, out)."""
    def linear(k, fan_in, fan_out):
        kw, kb = jax.random.split(k)
        bound = 1.0 / jnp.sqrt(fan_in)
        w = jax.random.uniform(kw, (fan_in, fan_out), jnp.float32, -bound, bound)
        b = jax.random.uniform(kb, (1, fan_out), jnp.float32, -bound, bound)
        return w, b

    keys = jax.random.split(key, 5)
    w_ih, b_ih = linear(keys[0], input_dim, hidden_dim)
    w_mu, b_mu = linear(keys[1], hidden_dim, latent_dim)
    w_lv, b_lv = linear(keys[2], hidden_dim, latent_dim)
    w_lh, b_lh = linear(keys[3], latent_dim, hidden_dim)
    w_ho, b_ho = linear(keys[4], hidden_dim, input_dim)
    return dict(
        w_ih=w_ih, b_ih=b_ih, w_mu=w_mu, b_mu=b_mu, w_lv=w_lv, b_lv=b_lv,
        w_lh=w_lh, b_lh=b_lh, w_ho=w_ho, b_ho=b_ho,
    )


def vae_forward_ref(x, eps, p):
    """Pure-JAX f32 reference mirroring the PyTorch forward."""
    h = jnp.maximum(x @ p["w_ih"] + p["b_ih"], 0.0)
    mu = h @ p["w_mu"] + p["b_mu"]
    logvar = h @ p["w_lv"] + p["b_lv"]
    z = mu + jnp.exp(0.5 * logvar) * eps          # == sqrt(exp(logvar)) * eps
    h2 = jnp.maximum(z @ p["w_lh"] + p["b_lh"], 0.0)
    xr = h2 @ p["w_ho"] + p["b_ho"]
    return xr, z, mu, logvar


if __name__ == "__main__":
    batch, input_dim, hidden_dim, latent_dim = 8, 64, 32, 16

    key = jax.random.PRNGKey(0)
    k_params, k_x, k_eps = jax.random.split(key, 3)

    params = init_params(k_params, input_dim, hidden_dim, latent_dim)
    kparams = prepare_params(params)           # one-time prep (fuse/pad/bf16-cast)
    x = jax.random.normal(k_x, (batch, input_dim), jnp.float32)
    eps = jax.random.normal(k_eps, (batch, latent_dim), jnp.float32)

    outs = vae_forward(x, eps, kparams)
    outs = jax.block_until_ready(outs)

    refs = vae_forward_ref(x, eps, params)
    # bf16 MXU inputs with f32 accumulation: loosen the tolerance vs the f32 ref.
    for o, r in zip(outs, refs):
        assert o.shape == r.shape and o.dtype == r.dtype
        assert bool(jnp.all(jnp.isfinite(o)))
        assert jnp.allclose(o, r, atol=5e-2, rtol=5e-2), "mismatch vs reference"

    print("KERNEL_OK")
</pallas_src>

<mosaic_0001>
module attributes {stable_mosaic.version = 11 : i64} {
  func.func @_vae_fwd_kernel(%arg0: i32, %arg1: memref<8x64xf32, #tpu.memory_space<vmem>>, %arg2: memref<8x128xf32, #tpu.memory_space<vmem>>, %arg3: memref<64x32xbf16, #tpu.memory_space<vmem>>, %arg4: memref<1x32xf32, #tpu.memory_space<vmem>>, %arg5: memref<32x256xbf16, #tpu.memory_space<vmem>>, %arg6: memref<1x256xf32, #tpu.memory_space<vmem>>, %arg7: memref<128x32xbf16, #tpu.memory_space<vmem>>, %arg8: memref<1x32xf32, #tpu.memory_space<vmem>>, %arg9: memref<32x128xbf16, #tpu.memory_space<vmem>>, %arg10: memref<1x128xf32, #tpu.memory_space<vmem>>, %arg11: memref<8x128xf32, #tpu.memory_space<vmem>>, %arg12: memref<8x128xf32, #tpu.memory_space<vmem>>, %arg13: memref<8x128xf32, #tpu.memory_space<vmem>>, %arg14: memref<8x128xf32, #tpu.memory_space<vmem>>) attributes {dimension_semantics = [#tpu.dimension_semantics<parallel>], iteration_bounds = array<i64: 1>, scalar_prefetch = 0 : i64, scratch_operands = 0 : i64, tpu.core_type = #tpu.core_type<tc>, window_params = [{transform_indices = @transform_0, window_bounds = array<i64: 8, 64>}, {transform_indices = @transform_1, window_bounds = array<i64: 8, 128>}, {pipeline_mode = #tpu.pipeline_mode<synchronous>, transform_indices = @transform_2, window_bounds = array<i64: 64, 32>}, {pipeline_mode = #tpu.pipeline_mode<synchronous>, transform_indices = @transform_3, window_bounds = array<i64: 1, 32>}, {pipeline_mode = #tpu.pipeline_mode<synchronous>, transform_indices = @transform_4, window_bounds = array<i64: 32, 256>}, {pipeline_mode = #tpu.pipeline_mode<synchronous>, transform_indices = @transform_5, window_bounds = array<i64: 1, 256>}, {pipeline_mode = #tpu.pipeline_mode<synchronous>, transform_indices = @transform_6, window_bounds = array<i64: 128, 32>}, {pipeline_mode = #tpu.pipeline_mode<synchronous>, transform_indices = @transform_7, window_bounds = array<i64: 1, 32>}, {pipeline_mode = #tpu.pipeline_mode<synchronous>, transform_indices = @transform_8, window_bounds = array<i64: 32, 128>}, {pipeline_mode = #tpu.pipeline_mode<synchronous>, transform_indices = @transform_9, window_bounds = array<i64: 1, 128>}, {transform_indices = @transform_10, window_bounds = array<i64: 8, 128>}, {transform_indices = @transform_11, window_bounds = array<i64: 8, 128>}, {transform_indices = @transform_12, window_bounds = array<i64: 8, 128>}, {transform_indices = @transform_13, window_bounds = array<i64: 8, 128>}]} {
    %c0 = arith.constant 0 : index
    %c0_0 = arith.constant 0 : index
    %0 = vector.load %arg1[%c0, %c0_0] : memref<8x64xf32, #tpu.memory_space<vmem>>, vector<8x64xf32>
    %1 = arith.truncf %0 : vector<8x64xf32> to vector<8x64xbf16>
    %c0_1 = arith.constant 0 : index
    %c0_2 = arith.constant 0 : index
    %2 = vector.load %arg3[%c0_1, %c0_2] : memref<64x32xbf16, #tpu.memory_space<vmem>>, vector<64x32xbf16>
    %cst = arith.constant dense<0.000000e+00> : vector<8x32xf32>
    %3 = tpu.matmul %1, %2, %cst {dimension_numbers = #tpu.dot_dimension_numbers<[1], [0], [0], [1], [0, 0, 1, 1], [], []>} : vector<8x64xbf16>, vector<64x32xbf16>, vector<8x32xf32> -> vector<8x32xf32>
    %c0_3 = arith.constant 0 : index
    %c0_4 = arith.constant 0 : index
    %4 = vector.load %arg4[%c0_3, %c0_4] : memref<1x32xf32, #tpu.memory_space<vmem>>, vector<1x32xf32>
    %5 = vector.broadcast %4 : vector<1x32xf32> to vector<8x32xf32>
    %6 = arith.addf %3, %5 : vector<8x32xf32>
    %cst_5 = arith.constant 0.000000e+00 : f32
    %7 = vector.broadcast %cst_5 : f32 to vector<8x32xf32>
    %8 = arith.maximumf %6, %7 : vector<8x32xf32>
    %9 = arith.truncf %8 : vector<8x32xf32> to vector<8x32xbf16>
    %c0_6 = arith.constant 0 : index
    %c0_7 = arith.constant 0 : index
    %10 = vector.load %arg5[%c0_6, %c0_7] : memref<32x256xbf16, #tpu.memory_space<vmem>>, vector<32x256xbf16>
    %cst_8 = arith.constant dense<0.000000e+00> : vector<8x256xf32>
    %11 = tpu.matmul %9, %10, %cst_8 {dimension_numbers = #tpu.dot_dimension_numbers<[1], [0], [0], [1], [0, 0, 1, 1], [], []>} : vector<8x32xbf16>, vector<32x256xbf16>, vector<8x256xf32> -> vector<8x256xf32>
    %c0_9 = arith.constant 0 : index
    %c0_10 = arith.constant 0 : index
    %12 = vector.load %arg6[%c0_9, %c0_10] : memref<1x256xf32, #tpu.memory_space<vmem>>, vector<1x256xf32>
    %13 = vector.broadcast %12 : vector<1x256xf32> to vector<8x256xf32>
    %14 = arith.addf %11, %13 : vector<8x256xf32>
    %15 = vector.extract_strided_slice %14 {offsets = [0, 0], sizes = [8, 128], strides = [1, 1]} : vector<8x256xf32> to vector<8x128xf32>
    %16 = vector.extract_strided_slice %14 {offsets = [0, 128], sizes = [8, 128], strides = [1, 1]} : vector<8x256xf32> to vector<8x128xf32>
    %cst_11 = arith.constant 5.000000e-01 : f32
    %17 = vector.broadcast %cst_11 : f32 to vector<8x128xf32>
    %18 = arith.mulf %17, %16 : vector<8x128xf32>
    %19 = math.exp %18 : vector<8x128xf32>
    %c0_12 = arith.constant 0 : index
    %c0_13 = arith.constant 0 : index
    %20 = vector.load %arg2[%c0_12, %c0_13] : memref<8x128xf32, #tpu.memory_space<vmem>>, vector<8x128xf32>
    %21 = arith.mulf %19, %20 : vector<8x128xf32>
    %22 = arith.addf %15, %21 : vector<8x128xf32>
    %23 = arith.truncf %22 : vector<8x128xf32> to vector<8x128xbf16>
    %c0_14 = arith.constant 0 : index
    %c0_15 = arith.constant 0 : index
    %24 = vector.load %arg7[%c0_14, %c0_15] : memref<128x32xbf16, #tpu.memory_space<vmem>>, vector<128x32xbf16>
    %cst_16 = arith.constant dense<0.000000e+00> : vector<8x32xf32>
    %25 = tpu.matmul %23, %24, %cst_16 {dimension_numbers = #tpu.dot_dimension_numbers<[1], [0], [0], [1], [0, 0, 1, 1], [], []>} : vector<8x128xbf16>, vector<128x32xbf16>, vector<8x32xf32> -> vector<8x32xf32>
    %c0_17 = arith.constant 0 : index
    %c0_18 = arith.constant 0 : index
    %26 = vector.load %arg8[%c0_17, %c0_18] : memref<1x32xf32, #tpu.memory_space<vmem>>, vector<1x32xf32>
    %27 = vector.broadcast %26 : vector<1x32xf32> to vector<8x32xf32>
    %28 = arith.addf %25, %27 : vector<8x32xf32>
    %cst_19 = arith.constant 0.000000e+00 : f32
    %29 = vector.broadcast %cst_19 : f32 to vector<8x32xf32>
    %30 = arith.maximumf %28, %29 : vector<8x32xf32>
    %31 = arith.truncf %30 : vector<8x32xf32> to vector<8x32xbf16>
    %c0_20 = arith.constant 0 : index
    %c0_21 = arith.constant 0 : index
    %32 = vector.load %arg9[%c0_20, %c0_21] : memref<32x128xbf16, #tpu.memory_space<vmem>>, vector<32x128xbf16>
    %cst_22 = arith.constant dense<0.000000e+00> : vector<8x128xf32>
    %33 = tpu.matmul %31, %32, %cst_22 {dimension_numbers = #tpu.dot_dimension_numbers<[1], [0], [0], [1], [0, 0, 1, 1], [], []>} : vector<8x32xbf16>, vector<32x128xbf16>, vector<8x128xf32> -> vector<8x128xf32>
    %c0_23 = arith.constant 0 : index
    %c0_24 = arith.constant 0 : index
    %34 = vector.load %arg10[%c0_23, %c0_24] : memref<1x128xf32, #tpu.memory_space<vmem>>, vector<1x128xf32>
    %35 = vector.broadcast %34 : vector<1x128xf32> to vector<8x128xf32>
    %36 = arith.addf %33, %35 : vector<8x128xf32>
    %c0_25 = arith.constant 0 : index
    %c0_26 = arith.constant 0 : index
    %37 = vector.load %arg11[%c0_25, %c0_26] : memref<8x128xf32, #tpu.memory_space<vmem>>, vector<8x128xf32>
    tpu.vector_store %arg11[%c0_25, %c0_26], %36 {strides = array<i32>} : memref<8x128xf32, #tpu.memory_space<vmem>>, vector<8x128xf32>,
    %c0_27 = arith.constant 0 : index
    %c0_28 = arith.constant 0 : index
    %38 = vector.load %arg12[%c0_27, %c0_28] : memref<8x128xf32, #tpu.memory_space<vmem>>, vector<8x128xf32>
    tpu.vector_store %arg12[%c0_27, %c0_28], %22 {strides = array<i32>} : memref<8x128xf32, #tpu.memory_space<vmem>>, vector<8x128xf32>,
    %c0_29 = arith.constant 0 : index
    %c0_30 = arith.constant 0 : index
    %39 = vector.load %arg13[%c0_29, %c0_30] : memref<8x128xf32, #tpu.memory_space<vmem>>, vector<8x128xf32>
    tpu.vector_store %arg13[%c0_29, %c0_30], %15 {strides = array<i32>} : memref<8x128xf32, #tpu.memory_space<vmem>>, vector<8x128xf32>,
    %c0_31 = arith.constant 0 : index
    %c0_32 = arith.constant 0 : index
    %40 = vector.load %arg14[%c0_31, %c0_32] : memref<8x128xf32, #tpu.memory_space<vmem>>, vector<8x128xf32>
    tpu.vector_store %arg14[%c0_31, %c0_32], %16 {strides = array<i32>} : memref<8x128xf32, #tpu.memory_space<vmem>>, vector<8x128xf32>,
    return
  }
  func.func @transform_0(%arg0: i32) -> (i32, i32) {
    %c0_i32 = arith.constant 0 : i32
    %c0_i32_0 = arith.constant 0 : i32
    return %arg0, %c0_i32 : i32, i32
  }
  func.func @transform_1(%arg0: i32) -> (i32, i32) {
    %c0_i32 = arith.constant 0 : i32
    %c0_i32_0 = arith.constant 0 : i32
    return %arg0, %c0_i32 : i32, i32
  }
  func.func @transform_2(%arg0: i32) -> (i32, i32) {
    %c0_i32 = arith.constant 0 : i32
    %c0_i32_0 = arith.constant 0 : i32
    %c0_i32_1 = arith.constant 0 : i32
    return %c0_i32, %c0_i32_0 : i32, i32
  }
  func.func @transform_3(%arg0: i32) -> (i32, i32) {
    %c0_i32 = arith.constant 0 : i32
    %c0_i32_0 = arith.constant 0 : i32
    %c0_i32_1 = arith.constant 0 : i32
    return %c0_i32, %c0_i32_0 : i32, i32
  }
  func.func @transform_4(%arg0: i32) -> (i32, i32) {
    %c0_i32 = arith.constant 0 : i32
    %c0_i32_0 = arith.constant 0 : i32
    %c0_i32_1 = arith.constant 0 : i32
    return %c0_i32, %c0_i32_0 : i32, i32
  }
  func.func @transform_5(%arg0: i32) -> (i32, i32) {
    %c0_i32 = arith.constant 0 : i32
    %c0_i32_0 = arith.constant 0 : i32
    %c0_i32_1 = arith.constant 0 : i32
    return %c0_i32, %c0_i32_0 : i32, i32
  }
  func.func @transform_6(%arg0: i32) -> (i32, i32) {
    %c0_i32 = arith.constant 0 : i32
    %c0_i32_0 = arith.constant 0 : i32
    %c0_i32_1 = arith.constant 0 : i32
    return %c0_i32, %c0_i32_0 : i32, i32
  }
  func.func @transform_7(%arg0: i32) -> (i32, i32) {
    %c0_i32 = arith.constant 0 : i32
    %c0_i32_0 = arith.constant 0 : i32
    %c0_i32_1 = arith.constant 0 : i32
    return %c0_i32, %c0_i32_0 : i32, i32
  }
  func.func @transform_8(%arg0: i32) -> (i32, i32) {
    %c0_i32 = arith.constant 0 : i32
    %c0_i32_0 = arith.constant 0 : i32
    %c0_i32_1 = arith.constant 0 : i32
    return %c0_i32, %c0_i32_0 : i32, i32
  }
  func.func @transform_9(%arg0: i32) -> (i32, i32) {
    %c0_i32 = arith.constant 0 : i32
    %c0_i32_0 = arith.constant 0 : i32
    %c0_i32_1 = arith.constant 0 : i32
    return %c0_i32, %c0_i32_0 : i32, i32
  }
  func.func @transform_10(%arg0: i32) -> (i32, i32) {
    %c0_i32 = arith.constant 0 : i32
    %c0_i32_0 = arith.constant 0 : i32
    return %arg0, %c0_i32 : i32, i32
  }
  func.func @transform_11(%arg0: i32) -> (i32, i32) {
    %c0_i32 = arith.constant 0 : i32
    %c0_i32_0 = arith.constant 0 : i32
    return %arg0, %c0_i32 : i32, i32
  }
  func.func @transform_12(%arg0: i32) -> (i32, i32) {
    %c0_i32 = arith.constant 0 : i32
    %c0_i32_0 = arith.constant 0 : i32
    return %arg0, %c0_i32 : i32, i32
  }
  func.func @transform_13(%arg0: i32) -> (i32, i32) {
    %c0_i32 = arith.constant 0 : i32
    %c0_i32_0 = arith.constant 0 : i32
    return %arg0, %c0_i32 : i32, i32
  }
}

</mosaic_0001>

<bundles_post_ra>
// kernel: tpu_custom_call.1
= control target key start
LH: loop header
LB: loop body
LE: loop exit
PB: predicated region body
PF: predicated region fallthrough
CT: control target
= control target key end

     0   :  { %19 = vsyncpa [#allocation3], 0  ;;  %s835_s0 = inlined_call_operand.vmem [shape: f32[8,64], index: 0, kind: input, shape index: {}]   ;;  %s836_s1 = inlined_call_operand.vmem [shape: f32[8,128], index: 1, kind: input, shape index: {}]   ;;  %s837_s2 = inlined_call_operand.vmem [shape: bf16[64,32], index: 2, kind: input, shape index: {}]   ;;  %s838_s3 = inlined_call_operand.vmem [shape: f32[1,32], index: 3, kind: input, shape index: {}]   ;;  %s839_s4 = inlined_call_operand.vmem [shape: bf16[32,256], index: 4, kind: input, shape index: {}]   ;;  %s840_s5 = inlined_call_operand.vmem [shape: f32[1,256], index: 5, kind: input, shape index: {}]   ;;  %s841_s6 = inlined_call_operand.vmem [shape: bf16[128,32], index: 6, kind: input, shape index: {}]   ;;  %s842_s7 = inlined_call_operand.vmem [shape: f32[1,32], index: 7, kind: input, shape index: {}]   ;;  %s843_s8 = inlined_call_operand.vmem [shape: bf16[32,128], index: 8, kind: input, shape index: {}]   ;;  %s844_s9 = inlined_call_operand.vmem [shape: f32[1,128], index: 9, kind: input, shape index: {}]   ;;  %s845_s10 = inlined_call_operand.hbm [shape: f32[8,128], index: 10, kind: output, shape index: {0}]   ;;  %s846_s11 = inlined_call_operand.hbm [shape: f32[8,128], index: 11, kind: output, shape index: {1}]   ;;  %s847_s12 = inlined_call_operand.hbm [shape: f32[8,128], index: 12, kind: output, shape index: {2}]   ;;  %s848_s13 = inlined_call_operand.hbm [shape: f32[8,128], index: 13, kind: output, shape index: {3}]  }
   0x1   :  { %20 = vsyncpa [#allocation5], 0  ;;  %v544_v0 = vld [vmem:[%s837_s2 + $0x18] sm:$0xff]   ;;  %v652_v1 = vmov 0.0   ;;  %v545_v2 = vld [vmem:[%s837_s2 + $0x10] sm:$0xff]   ;;  %vm653_vm0 = vmmov 0  }
   0x2   :  { %497 = vmatprep.subr.bf16.mxu0 %v652_v1  ;;  %509 = vmatprep.subr.bf16.mxu1 %v652_v1  ;;  %v546_v3 = vld [vmem:[%s837_s2 + $0x8] sm:$0xff]   ;;  %v547_v4 = vld [vmem:[%s837_s2] sm:$0xff]   ;;  %v550_v6 = vld [vmem:[%s839_s4 + $0x14] ss:$8 sps:$4 sm:$0xff]  }
   0x3   :  { %498 = vmatpush3.bf16.msra.mxu0 %v544_v0  ;;  %505 = vmatprep.mubr.msk.bf16.mxu0 %vm653_vm0, %v652_v1  ;;  %v43_v5 = vld [vmem:[%s835_s0] sm:$0xff] }
   0x4   :  { %499 = vmatprep.subr.bf16.mxu0 %v652_v1  ;;  %525 = vmatprep.mubr.msk.bf16.mxu1 %vm653_vm0, %v652_v1  ;;  %v44_v7 = vpack.c.bf16 %v43_v5, %v43_v5 }
   0x7   :  { %500 = vmatpush3.bf16.msra.mxu0 %v545_v2 }
   0x8   :  { %501 = vmatprep.subr.bf16.mxu0 %v652_v1 }
   0xb   :  { %502 = vmatpush3.bf16.msra.mxu0 %v546_v3 }
   0xc   :  { %503 = vmatprep.subr.bf16.mxu0 %v652_v1 }
   0xd   :  { %21 = vsyncpa [#allocation8], 0  ;;  %vm84_vm1 = vcmask 523264   ;;  %v548_v8 = vld [vmem:[%s839_s4 + $0x10] ss:$8 sps:$4 sm:$0xff]   ;;  %v654_v11 = vmov 0   ;;  %v136_v29 = vlaneseq }
   0xe   :  { %v553_v9 = vld [vmem:[%s839_s4 + $0x4] ss:$8 sps:$4 sm:$0xff]   ;;  %v551_v10 = vld [vmem:[%s839_s4] ss:$8 sps:$4 sm:$0xff]   ;;  %v554_v12 = vld [vmem:[%s841_s6 + $0x38] sm:$0xff]   ;;  %vm166_vm2 = vcmask 261120  }
   0xf   :  { %504 = vmatpush3.bf16.msra.mxu0 %v547_v4  ;;  %510 = vmatpush3.bf16.msra.mxu1 %v554_v12  ;;  %v456_v13 = vld [vmem:[%s838_s3] ss:$0 sm:$0xff]  ;;  %v555_v21 = vld [vmem:[%s841_s6 + $0x30] sm:$0xff]   ;;  %v556_v22 = vld [vmem:[%s841_s6 + $0x28] sm:$0xff]   ;;  %v137_v30 = vshrl.u32 %v136_v29, 7 }
  0x10   :  { %182 = vmatprep.subr.bf16.mxu0 %v550_v6  ;;  %511 = vmatprep.subr.bf16.mxu1 %v652_v1  ;;  %v557_v23 = vld [vmem:[%s841_s6 + $0x20] sm:$0xff]   ;;  %v558_v24 = vld [vmem:[%s841_s6 + $0x18] sm:$0xff]   ;;  %v559_v25 = vld [vmem:[%s841_s6 + $0x10] sm:$0xff]  }
  0x11   :  { %v560_v26 = vld [vmem:[%s841_s6 + $0x8] sm:$0xff]   ;;  %v561_v27 = vld [vmem:[%s841_s6] sm:$0xff]   ;;  %v138_v31 = vsub.s32 0, %v137_v30  ;;  %v142_v33 = vsub.s32 1, %v137_v30 }
  0x12   :  { %506 = vmatmul.mubr.msk.bf16.vlgmr.msra.gmra.mxu0 %vm84_vm1, %v44_v7  ;;  %v562_v28 = vld [vmem:[%s843_s8 + $0x8] sm:$0xff]   ;;  %v134_v32 = vld [vmem:[%s840_s5] sm:$0x3] }
  0x13   :  { %183 = vmatpush1.bf16.msra.mxu0 %v548_v8  ;;  %202 = vmatprep.mubr.bf16.mxu0 %v654_v11  ;;  %v139_v34 = vrot.slane %v134_v32, %v138_v31  ;;  %v143_v35 = vrot.slane %v134_v32, %v142_v33  ;;  %v214_v44 = vld [vmem:[%s836_s1] sm:$0xff]  ;;  %s655_s1 = smov [#allocation4]  }
  0x14   :  { %184 = vmatprep.subr.bf16.mxu0 %v553_v9  ;;  %512 = vmatpush3.bf16.msra.mxu1 %v555_v21  ;;  %v563_v49 = vld [vmem:[%s843_s8] sm:$0xff]   ;;  %s417_s28 = sshll.u32 %s655_s1, 4  ;;  %s418_s28 = int_to_ptr.vmem [resolvable:$true] %s417_s28 }
  0x15   :  { %513 = vmatprep.subr.bf16.mxu1 %v652_v1  ;;  %v467_v50 = vld [vmem:[%s842_s7] ss:$0 sm:$0xff]  ;;  %s566_s3 = scalar_lea.vmem %s418_s28, 128  ;;  %p571_p1 = scmp.lt.s32.totalorder %s418_s28, %s418_s28 }
  0x16   :  { %p567_p0 = scmp.ne.s32.totalorder %s418_s28, %s566_s3  ;;  %p572_p2 = scmp.lt.s32.totalorder %s566_s3, %s566_s3 }
  0x17   :  { %185 = vmatpush1.bf16.msra.mxu0 %v551_v10 }
  0x18   :  { %529 = vmatprep.subr.bf16.mxu0 %v652_v1  ;;  %514 = vmatpush3.bf16.msra.mxu1 %v556_v22  ;;  %p573_p3 = por %p572_p2, %p571_p1 }
  0x19   :  { %515 = vmatprep.subr.bf16.mxu1 %v652_v1 }
  0x1a   :  { %p574_p4 = pnand %p573_p3, %p567_p0 }
  0x1c   :  { %516 = vmatpush3.bf16.msra.mxu1 %v557_v23 }
  0x1d   :  { %517 = vmatprep.subr.bf16.mxu1 %v652_v1 }
  0x20   :  { %518 = vmatpush3.bf16.msra.mxu1 %v558_v24 }
  0x21   :  { %519 = vmatprep.subr.bf16.mxu1 %v652_v1 }
  0x24   :  { %520 = vmatpush3.bf16.msra.mxu1 %v559_v25 }
  0x25   :  { %521 = vmatprep.subr.bf16.mxu1 %v652_v1 }
  0x28   :  { %522 = vmatpush3.bf16.msra.mxu1 %v560_v26 }
  0x29   :  { %523 = vmatprep.subr.bf16.mxu1 %v652_v1 }
  0x2c   :  { %524 = vmatpush3.bf16.msra.mxu1 %v561_v27 }
  0xd2   :  { %v122_v14 = vpop.f32.mrf.mxu0 }
  0xd3   :  { %v123_v15 = vadd.f32 %v456_v13, %v122_v14 }
  0xd4   :  { %v507_v16 = vpop.f32.mrf.mxu0 }
  0xd5   :  { %v128_v17 = vmax.f32 %v123_v15, 0.0 }
  0xd6   :  { %v125_v18 = vpop.f32.mrf.mxu0 }
  0xd7   :  { %v129_v19 = vpack.c.bf16 %v128_v17, %v128_v17 }
  0xd8   :  { %v508_v20 = vpop.f32.mrf.mxu0 }
  0xd9   :  { %466 = vmatmul.mubr.msk.bf16.vlgmr.msra.gmra.mxu0 %vm166_vm2, %v129_v19 }
  0xda   :  { %533 = vmatprep.mubr.msk.bf16.mxu0 %vm653_vm0, %v652_v1  ;;  %530 = vmatpush3.bf16.msra.mxu0 %v562_v28 }
  0xdb   :  { %531 = vmatprep.subr.bf16.mxu0 %v652_v1 }
  0xde   :  { %532 = vmatpush3.bf16.msra.mxu0 %v563_v49 }
 0x199   :  { %v204_v36 = vpop.f32.mrf.mxu0 }
 0x19a   :  { %v205_v37 = vadd.f32 %v204_v36, %v139_v34 }
 0x19b   :  { %v206_v38 = vpop.f32.mrf.mxu0 }
 0x19c   :  { %399 = vst [vmem:[#allocation6] sm:$0xff] %v205_v37  ;;  %v207_v39 = vadd.f32 %v206_v38, %v143_v35 }
 0x19d   :  { %v208_v40 = vpop.f32.mrf.mxu0 }
 0x19e   :  { %v211_v41 = vmul.f32 0.5, %v207_v39  ;;  %400 = vst [vmem:[#allocation7] sm:$0xff] %v207_v39 }
 0x19f   :  { %v209_v42 = vpop.f32.mrf.mxu0 }
 0x1a0   :  { %v212_v43 = vmul.f32 1.442695, %v211_v41 }
 0x1a2   :  { %564 = vpow2.f32 %v212_v43 }
 0x1af   :  { %v565_v45 = vpop.eup %564 }
 0x1b0   :  { %v215_v46 = vmul.f32 %v565_v45, %v214_v44 }
 0x1b2   :  { %v216_v47 = vadd.f32 %v215_v46, %v205_v37 }
 0x1b4   :  { %v217_v48 = vpack.c.bf16 %v216_v47, %v216_v47  ;;  %398 = vst [vmem:[#allocation4] sm:$0xff] %v216_v47 }
 0x1b6   :  { %526 = vmatmul.mubr.bf16.vlgmr.msra.gmra.mxu1 %v217_v48 }
 0x276   :  { %v323_v51 = vpop.f32.mrf.mxu1 }
 0x277   :  { %v324_v52 = vadd.f32 %v467_v50, %v323_v51 }
 0x278   :  { %v527_v53 = vpop.f32.mrf.mxu1 }
 0x279   :  { %v329_v54 = vmax.f32 %v324_v52, 0.0 }
 0x27a   :  { %v326_v55 = vpop.f32.mrf.mxu1 }
 0x27b   :  { %v330_v56 = vpack.c.bf16 %v329_v54, %v329_v54 }
 0x27c   :  { %v528_v57 = vpop.f32.mrf.mxu1 }
 0x27d   :  { %534 = vmatmul.mubr.msk.bf16.vlgmr.msra.gmra.mxu0 %vm166_vm2, %v330_v56 }
 0x27e   :  { %577 = shalt.err (!%p574_p4)
}
 0x27f   :  { %420 = dma.vmem_to_hbm [thread:$0]  %s418_s28, 128, %s846_s11, [#allocation5]  }
 0x280   :  { %s656_s29 = smov [#allocation6]   ;;  %s657_s14 = smov [#allocation7]  }
 0x281   :  { %s427_s30 = sshll.u32 %s656_s29, 4  ;;  %s437_s15 = sshll.u32 %s657_s14, 4  ;;  %s428_s30 = int_to_ptr.vmem [resolvable:$true] %s427_s30  ;;  %s438_s15 = int_to_ptr.vmem [resolvable:$true] %s437_s15 }
 0x282   :  { %s586_s16 = scalar_lea.vmem %s428_s30, 128  ;;  %p591_p6 = scmp.lt.s32.totalorder %s428_s30, %s428_s30 }
 0x283   :  { %p587_p5 = scmp.ne.s32.totalorder %s428_s30, %s586_s16  ;;  %p592_p7 = scmp.lt.s32.totalorder %s586_s16, %s586_s16 }
 0x285   :  { %p593_p8 = por %p592_p7, %p591_p6 }
 0x287   :  { %p594_p9 = pnand %p593_p8, %p587_p5 }
 0x289   :  { %597 = shalt.err (!%p594_p9)
}
 0x28a   :  { %430 = dma.vmem_to_hbm [thread:$0]  %s428_s30, 128, %s847_s12, [#allocation5]  }
 0x28b   :  { %s606_s19 = scalar_lea.vmem %s438_s15, 128  ;;  %p611_p11 = scmp.lt.s32.totalorder %s438_s15, %s438_s15 }
 0x28c   :  { %p607_p10 = scmp.ne.s32.totalorder %s438_s15, %s606_s19  ;;  %p612_p12 = scmp.lt.s32.totalorder %s606_s19, %s606_s19 }
 0x28e   :  { %p613_p13 = por %p612_p12, %p611_p11 }
 0x290   :  { %p614_p0 = pnand %p613_p13, %p607_p10 }
 0x292   :  { %617 = shalt.err (!%p614_p0)
}
 0x293   :  { %440 = dma.vmem_to_hbm [thread:$0]  %s438_s15, 128, %s848_s13, [#allocation8]   ;;  %v476_v58 = vld [vmem:[%s844_s9] ss:$0 sm:$0xff] }
 0x294   :  { %s658_s0 = smov [#allocation2]  }
 0x295   :  { %s407_s22 = sshll.u32 %s658_s0, 4  ;;  %s408_s22 = int_to_ptr.vmem [resolvable:$true] %s407_s22 }
 0x296   :  { %s626_s12 = scalar_lea.vmem %s408_s22, 128  ;;  %p631_p2 = scmp.lt.s32.totalorder %s408_s22, %s408_s22 }
 0x297   :  { %p627_p1 = scmp.ne.s32.totalorder %s408_s22, %s626_s12  ;;  %p632_p3 = scmp.lt.s32.totalorder %s626_s12, %s626_s12 }
 0x299   :  { %p633_p4 = por %p632_p3, %p631_p2 }
 0x29b   :  { %p634_p5 = pnand %p633_p4, %p627_p1 }
 0x33d   :  { %v391_v59 = vpop.f32.mrf.mxu0 }
 0x33e   :  { %v392_v60 = vadd.f32 %v476_v58, %v391_v59 }
 0x33f   :  { %v535_v61 = vpop.f32.mrf.mxu0 }
 0x340   :  { %397 = vst [vmem:[#allocation2] sm:$0xff] %v392_v60 }
 0x341   :  { %v394_v62 = vpop.f32.mrf.mxu0 }
 0x342   :  { %637 = shalt.err (!%p634_p5)
}
 0x343   :  { %410 = dma.vmem_to_hbm [thread:$0]  %s408_s22, 128, %s845_s10, [#allocation3]   ;;  %v536_v63 = vpop.f32.mrf.mxu0 }
 0x344   :  { %646 = dma.done.wait [#allocation3], 128  }
 0x345   :  { %647 = vsyncadd [#allocation3], 4294967168 }
 0x346   :  { %648 = dma.done.wait [#allocation5], 256  }
 0x347   :  { %649 = vsyncadd [#allocation5], 4294967040 }
 0x348   :  { %650 = dma.done.wait [#allocation8], 128  }
 0x349   :  { %651 = vsyncadd [#allocation8], 4294967168 }
 0x34a   :  { %453 = vsyncpa [#allocation3], 1 }
 0x34b   :  { %454 = vsyncpa [#allocation5], 1 }
 0x34c   :  { %455 = vsyncpa [#allocation8], 1 }

</bundles_post_ra>
